<compile_context>
chip_gen: v7x
topology: tpu7x:2x2x1
jax: 0.10.0
libtpu: 0.0.40
codegen_flags: <defaults>
</compile_context>

<pallas_src>
import numpy as np
import jax
import jax.numpy as jnp
from jax.experimental import pallas as pl
from jax.experimental.pallas import tpu as pltpu

# ----------------------- model hyper-params (small) ------------------------
B = 2            # batch
S = 8            # sequence length of the input
D_MODEL = 32     # feature dim
SEQ_LEN = 2816   # length of the precomputed positional table (module default)
DOUT_P = 0.1     # dropout prob (identity in eval forward)

LANE = 128


# --------------------------- Pallas kernel ----------------------------------
def pos_enc_kernel(x_ref, pe_ref, o_ref):
    # x_ref : (tb, R, 128)  lane-dense batch-row tile
    # pe_ref: (1,  R, 128)  positional encoding, broadcast over batch on the VPU
    # o_ref : (tb, R, 128)  aliased with x's HBM buffer
    # Dropout = identity (eval-mode deterministic forward).
    o_ref[...] = x_ref[...] + pe_ref[...]


# ------------------------------ wrapper --------------------------------------
@jax.jit
def positional_encoder_feat(x, pos_enc_mat):
    """x: (B, S, D) float32; pos_enc_mat: (SEQ_LEN, D) float32."""
    b, s, d = x.shape
    sd = s * d

    # Slice table to first S positions (== pos_enc_mat[:, :S, :]).
    pe = pos_enc_mat[:s, :].astype(x.dtype)

    if sd % LANE == 0:
        # Lane-dense layout: last dim = 128 lanes, unmasked vld/vadd/vst.
        rows = sd // LANE
        x3 = x.reshape(b, rows, LANE)
        pe3 = pe.reshape(1, rows, LANE)
    else:
        # Fallback: block == full array dims, still a single unsplit tile.
        rows = s
        x3 = x.reshape(b, s, d)
        pe3 = pe.reshape(1, s, d)

    # Row (batch) tiling: single step at small B, shards across cores at scale.
    row_tile = b if b <= 512 else 512
    if b % row_tile != 0:
        row_tile = b
    grid = (b // row_tile,)

    blk_in = (row_tile,) + x3.shape[1:]
    blk_pe = (1,) + pe3.shape[1:]

    out3 = pl.pallas_call(
        pos_enc_kernel,
        out_shape=jax.ShapeDtypeStruct(x3.shape, x3.dtype),
        grid=grid,
        in_specs=[
            pl.BlockSpec(blk_in, lambda i: (i, 0, 0)),
            pl.BlockSpec(blk_pe, lambda i: (0, 0, 0)),
        ],
        out_specs=pl.BlockSpec(blk_in, lambda i: (i, 0, 0)),
        input_output_aliases={0: 0},   # reuse x's buffer for the output
        compiler_params=pltpu.CompilerParams(
            dimension_semantics=("parallel",)),
    )(x3, pe3)

    return out3.reshape(b, s, d)


# ------------------- positional table (mirrors __init__) --------------------
def build_pos_enc_mat(seq_len, d_model):
    # NOTE: exponent is idx/d_model (the module's quirk), not 2i/d_model.
    pe = np.zeros((seq_len, d_model), dtype=np.float64)
    odds = np.arange(0, d_model, 2)    # even column indices (named "odds" in the module)
    evens = np.arange(1, d_model, 2)   # odd column indices
    pos = np.arange(seq_len, dtype=np.float64)[:, None]
    pe[:, odds] = np.sin(pos / 10000 ** (odds / d_model))
    pe[:, evens] = np.cos(pos / 10000 ** (evens / d_model))
    return jnp.asarray(pe, dtype=jnp.float32)


# ------------------------- pure-JAX reference --------------------------------
def reference(x, pos_enc_mat):
    b, s, d = x.shape
    return x + pos_enc_mat[None, :s, :].astype(x.dtype)


if __name__ == "__main__":
    key = jax.random.PRNGKey(0)
    x = jax.random.normal(key, (B, S, D_MODEL), jnp.float32)
    pos_enc_mat = build_pos_enc_mat(SEQ_LEN, D_MODEL)

    out = positional_encoder_feat(x, pos_enc_mat)
    out = jax.block_until_ready(out)

    ref = reference(x, pos_enc_mat)
    assert out.shape == (B, S, D_MODEL)
    assert jnp.allclose(out, ref, atol=1e-6, rtol=1e-6), float(jnp.max(jnp.abs(out - ref)))
    print("KERNEL_OK")
</pallas_src>

<mosaic_0001>
module attributes {stable_mosaic.version = 11 : i64} {
  func.func @pos_enc_kernel(%arg0: i32, %arg1: memref<2x2x128xf32, #tpu.memory_space<vmem>>, %arg2: memref<1x2x128xf32, #tpu.memory_space<vmem>>, %arg3: memref<2x2x128xf32, #tpu.memory_space<vmem>>) attributes {dimension_semantics = [#tpu.dimension_semantics<parallel>], iteration_bounds = array<i64: 1>, scalar_prefetch = 0 : i64, scratch_operands = 0 : i64, tpu.core_type = #tpu.core_type<tc>, window_params = [{transform_indices = @transform_0, window_bounds = array<i64: 2, 2, 128>}, {pipeline_mode = #tpu.pipeline_mode<synchronous>, transform_indices = @transform_1, window_bounds = array<i64: 1, 2, 128>}, {transform_indices = @transform_2, window_bounds = array<i64: 2, 2, 128>}]} {
    %c0 = arith.constant 0 : index
    %c0_0 = arith.constant 0 : index
    %c0_1 = arith.constant 0 : index
    %0 = vector.load %arg1[%c0, %c0_0, %c0_1] : memref<2x2x128xf32, #tpu.memory_space<vmem>>, vector<2x2x128xf32>
    %c0_2 = arith.constant 0 : index
    %c0_3 = arith.constant 0 : index
    %c0_4 = arith.constant 0 : index
    %1 = vector.load %arg2[%c0_2, %c0_3, %c0_4] : memref<1x2x128xf32, #tpu.memory_space<vmem>>, vector<1x2x128xf32>
    %2 = vector.broadcast %1 : vector<1x2x128xf32> to vector<2x2x128xf32>
    %3 = arith.addf %0, %2 : vector<2x2x128xf32>
    %c0_5 = arith.constant 0 : index
    %c0_6 = arith.constant 0 : index
    %c0_7 = arith.constant 0 : index
    %4 = vector.load %arg3[%c0_5, %c0_6, %c0_7] : memref<2x2x128xf32, #tpu.memory_space<vmem>>, vector<2x2x128xf32>
    tpu.vector_store %arg3[%c0_5, %c0_6, %c0_7], %3 {strides = array<i32>} : memref<2x2x128xf32, #tpu.memory_space<vmem>>, vector<2x2x128xf32>,
    return
  }
  func.func @transform_0(%arg0: i32) -> (i32, i32, i32) {
    %c0_i32 = arith.constant 0 : i32
    %c0_i32_0 = arith.constant 0 : i32
    %c0_i32_1 = arith.constant 0 : i32
    return %arg0, %c0_i32, %c0_i32_0 : i32, i32, i32
  }
  func.func @transform_1(%arg0: i32) -> (i32, i32, i32) {
    %c0_i32 = arith.constant 0 : i32
    %c0_i32_0 = arith.constant 0 : i32
    %c0_i32_1 = arith.constant 0 : i32
    %c0_i32_2 = arith.constant 0 : i32
    return %c0_i32, %c0_i32_0, %c0_i32_1 : i32, i32, i32
  }
  func.func @transform_2(%arg0: i32) -> (i32, i32, i32) {
    %c0_i32 = arith.constant 0 : i32
    %c0_i32_0 = arith.constant 0 : i32
    %c0_i32_1 = arith.constant 0 : i32
    return %arg0, %c0_i32, %c0_i32_0 : i32, i32, i32
  }
}

</mosaic_0001>

<bundles_post_ra>
// kernel: positional_encoder_feat.1
= control target key start
LH: loop header
LB: loop body
LE: loop exit
PB: predicated region body
PF: predicated region fallthrough
CT: control target
= control target key end

     0   :  { %s52_s0 = inlined_call_operand.vmem [shape: f32[2,2,128], index: 0, kind: input, shape index: {}, may-alias: {0,2}]   ;;  %s53_s1 = inlined_call_operand.vmem [shape: f32[1,2,128], index: 1, kind: input, shape index: {}]   ;;  %s54_s2 = inlined_call_operand.vmem [shape: f32[2,2,128], index: 2, kind: output, shape index: {}, may-alias: {0,2}]  }
   0x1   :  { %v11_v0 = vld [vmem:[%s52_s0] sm:$0x3]  ;;  %v12_v2 = vld [vmem:[%s52_s0 + $0x2] sm:$0x3] }
   0x2   :  { %v13_v1 = vld [vmem:[%s53_s1] sm:$0x3] }
   0x3   :  { %v14_v3 = vadd.f32 %v13_v1, %v11_v0  ;;  %v15_v4 = vadd.f32 %v13_v1, %v12_v2 }
   0x5   :  { %16 = vst [vmem:[%s54_s2] sm:$0x3] %v14_v3  ;;  %17 = vst [vmem:[%s54_s2 + $0x2] sm:$0x3] %v15_v4 }

</bundles_post_ra>
